<compile_context>
chip_gen: v5e
topology: v5e:2x2
jax: 0.10.0
libtpu: 0.0.40
codegen_flags: <defaults>
</compile_context>

<pallas_src>
import jax
import jax.numpy as jnp
from jax.experimental import pallas as pl
from jax.experimental.pallas import tpu as pltpu


def _actor_kernel(x_ref, w_rnn_ref, b_rnn_ref, w1_ref, b1_ref, w2_ref, b2_ref, out_ref):
    # Single-step RNN cell (tanh). x_ref is either x or [x, h0]; w_rnn matches.
    h = jnp.tanh(
        jnp.dot(x_ref[...], w_rnn_ref[...], preferred_element_type=jnp.float32)
        + b_rnn_ref[...])

    # fc1 + relu
    y = jnp.maximum(
        jnp.dot(h, w1_ref[...], preferred_element_type=jnp.float32) + b1_ref[...],
        0.0)

    # action head (lane-padded to 128) + numerically-stable softmax over dim 1.
    logits = jnp.dot(y, w2_ref[...], preferred_element_type=jnp.float32) + b2_ref[...]
    m = jnp.max(logits, axis=-1, keepdims=True)
    e = jnp.exp(logits - m)
    # Exact divide (not approx reciprocal) to keep 1e-5 tolerance on probabilities.
    out_ref[...] = (e / jnp.sum(e, axis=-1, keepdims=True)).astype(out_ref.dtype)


def actor_forward(x, params, h0=None, *, tile_b=8):
    """x: (B, input_num); h0: optional (B, hidden). Returns softmax probs (B, num_output)."""
    B = x.shape[0]
    num_output = params["w2_t"].shape[1]
    o_pad = params["w2p_t"].shape[1]

    if h0 is None:
        # PyTorch h_state=None path: h0 == 0, so the h0 @ W_hh term vanishes.
        # Skip that matmul and the (H, H) weight DMA entirely.
        xin, w_rnn = x, params["wih_t"]
    else:
        # General path: one fused matmul [x, h0] @ concat([W_ih^T, W_hh^T], axis=0).
        xin, w_rnn = jnp.concatenate([x, h0], axis=1), params["w_rnn_cat"]

    k = xin.shape[1]
    hidden = w_rnn.shape[1]

    # Pad batch up to a full sublane multiple; padded rows are sliced off afterwards.
    b_pad = pl.cdiv(B, tile_b) * tile_b
    if b_pad != B:
        xin = jnp.pad(xin, ((0, b_pad - B), (0, 0)))

    const = lambda i: (0, 0)  # weights/biases resident in VMEM across grid steps
    out = pl.pallas_call(
        _actor_kernel,
        out_shape=jax.ShapeDtypeStruct((b_pad, o_pad), jnp.float32),
        grid=(b_pad // tile_b,),
        in_specs=[
            pl.BlockSpec((tile_b, k), lambda i: (i, 0)),   # activations: tiled over batch
            pl.BlockSpec((k, hidden), const),              # fused RNN weight
            pl.BlockSpec((1, hidden), const),              # folded RNN bias
            pl.BlockSpec((hidden, hidden), const),         # fc1 weight
            pl.BlockSpec((1, hidden), const),              # fc1 bias
            pl.BlockSpec((hidden, o_pad), const),          # action head weight (lane-padded)
            pl.BlockSpec((1, o_pad), const),               # action head bias (lane-padded)
        ],
        out_specs=pl.BlockSpec((tile_b, o_pad), lambda i: (i, 0)),
        compiler_params=pltpu.CompilerParams(dimension_semantics=("parallel",)),
    )(xin, w_rnn, params["b_rnn"], params["w1_t"], params["b1"],
      params["w2p_t"], params["b2p"])

    return out[:B, :num_output]


def init_params(key, input_num, hidden_num, num_output, lane_pad=128):
    """Deterministic init mirroring PyTorch shapes; weights stored pre-transposed
    as (in_features, out_features); RNN biases pre-folded; action head lane-padded."""
    ks = jax.random.split(key, 8)
    s = 1.0 / jnp.sqrt(hidden_num)  # PyTorch default U(-1/sqrt(H), 1/sqrt(H))
    u = lambda k, shape: jax.random.uniform(k, shape, jnp.float32, -s, s)

    wih_t = u(ks[0], (input_num, hidden_num))   # nn.RNN weight_ih_l0 (H, I) transposed
    whh_t = u(ks[1], (hidden_num, hidden_num))  # nn.RNN weight_hh_l0 (H, H) transposed
    bih = u(ks[2], (1, hidden_num))
    bhh = u(ks[3], (1, hidden_num))
    w1_t = u(ks[4], (hidden_num, hidden_num))   # fc1 (H, H) transposed
    b1 = u(ks[5], (1, hidden_num))
    w2_t = u(ks[6], (hidden_num, num_output))   # action_head (O, H) transposed
    b2 = u(ks[7], (1, num_output))

    # Lane-dense action head: zero weight columns + huge-negative bias on padded lanes,
    # so padded logits contribute exp(...) == 0 to the softmax denominator.
    o_pad = pl.cdiv(num_output, lane_pad) * lane_pad
    pad_o = o_pad - num_output
    w2p_t = jnp.pad(w2_t, ((0, 0), (0, pad_o)))
    b2p = jnp.pad(b2, ((0, 0), (0, pad_o)), constant_values=-1e30)

    return {
        "wih_t": wih_t,
        "whh_t": whh_t,
        "w_rnn_cat": jnp.concatenate([wih_t, whh_t], axis=0),  # (I+H, H) for h0 != None
        "b_rnn": bih + bhh,                                    # folded RNN bias
        "w1_t": w1_t, "b1": b1,
        "w2_t": w2_t, "b2": b2,                                # unpadded (for reference/slicing)
        "w2p_t": w2p_t, "b2p": b2p,                            # lane-padded (kernel operands)
    }


def actor_forward_ref(x, params, h0=None):
    """Pure-JAX reference of the same forward pass."""
    if h0 is None:
        h0 = jnp.zeros((x.shape[0], params["whh_t"].shape[0]), jnp.float32)
    h = jnp.tanh(x @ params["wih_t"] + h0 @ params["whh_t"] + params["b_rnn"])
    y = jnp.maximum(h @ params["w1_t"] + params["b1"], 0.0)
    logits = y @ params["w2_t"] + params["b2"]
    return jax.nn.softmax(logits, axis=1)


if __name__ == "__main__":
    B, INPUT_NUM, HIDDEN_NUM, NUM_OUTPUT = 2, 16, 32, 4

    key = jax.random.PRNGKey(0)
    k_x, k_h, k_p = jax.random.split(key, 3)

    # x as fed to forward(): it gets flattened per-sample, so (B, input_num).
    x = jax.random.normal(k_x, (B, INPUT_NUM), jnp.float32)
    params = init_params(k_p, INPUT_NUM, HIDDEN_NUM, NUM_OUTPUT)

    fwd = jax.jit(actor_forward)

    # Default PyTorch path: h_state=None -> zero initial hidden state (no W_hh matmul).
    probs = jax.block_until_ready(fwd(x, params))
    ref = actor_forward_ref(x, params)
    assert probs.shape == (B, NUM_OUTPUT)
    assert jnp.allclose(jnp.sum(probs, axis=1), 1.0, atol=1e-5)
    assert jnp.allclose(probs, ref, atol=1e-5, rtol=1e-5)

    # General path with an explicit hidden state (single fused [x, h0] matmul).
    h0 = jax.random.normal(k_h, (B, HIDDEN_NUM), jnp.float32)
    probs_h = jax.block_until_ready(fwd(x, params, h0))
    ref_h = actor_forward_ref(x, params, h0)
    assert jnp.allclose(probs_h, ref_h, atol=1e-5, rtol=1e-5)

    print("KERNEL_OK")
</pallas_src>

<mosaic_0001>
module attributes {stable_mosaic.version = 11 : i64} {
  func.func @_actor_kernel(%arg0: i32, %arg1: memref<8x16xf32, #tpu.memory_space<vmem>>, %arg2: memref<16x32xf32, #tpu.memory_space<vmem>>, %arg3: memref<1x32xf32, #tpu.memory_space<vmem>>, %arg4: memref<32x32xf32, #tpu.memory_space<vmem>>, %arg5: memref<1x32xf32, #tpu.memory_space<vmem>>, %arg6: memref<32x128xf32, #tpu.memory_space<vmem>>, %arg7: memref<1x128xf32, #tpu.memory_space<vmem>>, %arg8: memref<8x128xf32, #tpu.memory_space<vmem>>) attributes {dimension_semantics = [#tpu.dimension_semantics<parallel>], iteration_bounds = array<i64: 1>, scalar_prefetch = 0 : i64, scratch_operands = 0 : i64, tpu.core_type = #tpu.core_type<tc>, window_params = [{transform_indices = @transform_0, window_bounds = array<i64: 8, 16>}, {pipeline_mode = #tpu.pipeline_mode<synchronous>, transform_indices = @transform_1, window_bounds = array<i64: 16, 32>}, {pipeline_mode = #tpu.pipeline_mode<synchronous>, transform_indices = @transform_2, window_bounds = array<i64: 1, 32>}, {pipeline_mode = #tpu.pipeline_mode<synchronous>, transform_indices = @transform_3, window_bounds = array<i64: 32, 32>}, {pipeline_mode = #tpu.pipeline_mode<synchronous>, transform_indices = @transform_4, window_bounds = array<i64: 1, 32>}, {pipeline_mode = #tpu.pipeline_mode<synchronous>, transform_indices = @transform_5, window_bounds = array<i64: 32, 128>}, {pipeline_mode = #tpu.pipeline_mode<synchronous>, transform_indices = @transform_6, window_bounds = array<i64: 1, 128>}, {transform_indices = @transform_7, window_bounds = array<i64: 8, 128>}]} {
    %c0 = arith.constant 0 : index
    %c0_0 = arith.constant 0 : index
    %0 = vector.load %arg1[%c0, %c0_0] : memref<8x16xf32, #tpu.memory_space<vmem>>, vector<8x16xf32>
    %c0_1 = arith.constant 0 : index
    %c0_2 = arith.constant 0 : index
    %1 = vector.load %arg2[%c0_1, %c0_2] : memref<16x32xf32, #tpu.memory_space<vmem>>, vector<16x32xf32>
    %cst = arith.constant dense<0.000000e+00> : vector<8x32xf32>
    %2 = tpu.matmul %0, %1, %cst {dimension_numbers = #tpu.dot_dimension_numbers<[1], [0], [0], [1], [0, 0, 1, 1], [], []>} : vector<8x16xf32>, vector<16x32xf32>, vector<8x32xf32> -> vector<8x32xf32>
    %c0_3 = arith.constant 0 : index
    %c0_4 = arith.constant 0 : index
    %3 = vector.load %arg3[%c0_3, %c0_4] : memref<1x32xf32, #tpu.memory_space<vmem>>, vector<1x32xf32>
    %4 = vector.broadcast %3 : vector<1x32xf32> to vector<8x32xf32>
    %5 = arith.addf %2, %4 : vector<8x32xf32>
    %6 = math.tanh %5 : vector<8x32xf32>
    %c0_5 = arith.constant 0 : index
    %c0_6 = arith.constant 0 : index
    %7 = vector.load %arg4[%c0_5, %c0_6] : memref<32x32xf32, #tpu.memory_space<vmem>>, vector<32x32xf32>
    %cst_7 = arith.constant dense<0.000000e+00> : vector<8x32xf32>
    %8 = tpu.matmul %6, %7, %cst_7 {dimension_numbers = #tpu.dot_dimension_numbers<[1], [0], [0], [1], [0, 0, 1, 1], [], []>} : vector<8x32xf32>, vector<32x32xf32>, vector<8x32xf32> -> vector<8x32xf32>
    %c0_8 = arith.constant 0 : index
    %c0_9 = arith.constant 0 : index
    %9 = vector.load %arg5[%c0_8, %c0_9] : memref<1x32xf32, #tpu.memory_space<vmem>>, vector<1x32xf32>
    %10 = vector.broadcast %9 : vector<1x32xf32> to vector<8x32xf32>
    %11 = arith.addf %8, %10 : vector<8x32xf32>
    %cst_10 = arith.constant 0.000000e+00 : f32
    %12 = vector.broadcast %cst_10 : f32 to vector<8x32xf32>
    %13 = arith.maximumf %11, %12 : vector<8x32xf32>
    %c0_11 = arith.constant 0 : index
    %c0_12 = arith.constant 0 : index
    %14 = vector.load %arg6[%c0_11, %c0_12] : memref<32x128xf32, #tpu.memory_space<vmem>>, vector<32x128xf32>
    %cst_13 = arith.constant dense<0.000000e+00> : vector<8x128xf32>
    %15 = tpu.matmul %13, %14, %cst_13 {dimension_numbers = #tpu.dot_dimension_numbers<[1], [0], [0], [1], [0, 0, 1, 1], [], []>} : vector<8x32xf32>, vector<32x128xf32>, vector<8x128xf32> -> vector<8x128xf32>
    %c0_14 = arith.constant 0 : index
    %c0_15 = arith.constant 0 : index
    %16 = vector.load %arg7[%c0_14, %c0_15] : memref<1x128xf32, #tpu.memory_space<vmem>>, vector<1x128xf32>
    %17 = vector.broadcast %16 : vector<1x128xf32> to vector<8x128xf32>
    %18 = arith.addf %15, %17 : vector<8x128xf32>
    %cst_16 = arith.constant dense<0xFF800000> : vector<8xf32>
    %19 = vector.multi_reduction <maximumf>, %18, %cst_16 [1] : vector<8x128xf32> to vector<8xf32>
    %20 = vector.shape_cast %19 : vector<8xf32> to vector<8x1xf32>
    %21 = vector.broadcast %20 : vector<8x1xf32> to vector<8x128xf32>
    %22 = arith.subf %18, %21 : vector<8x128xf32>
    %23 = math.exp %22 : vector<8x128xf32>
    %cst_17 = arith.constant dense<0.000000e+00> : vector<8xf32>
    %24 = vector.multi_reduction <add>, %23, %cst_17 [1] : vector<8x128xf32> to vector<8xf32>
    %25 = vector.shape_cast %24 : vector<8xf32> to vector<8x1xf32>
    %26 = vector.broadcast %25 : vector<8x1xf32> to vector<8x128xf32>
    %27 = arith.divf %23, %26 : vector<8x128xf32>
    %c0_18 = arith.constant 0 : index
    %c0_19 = arith.constant 0 : index
    %28 = vector.load %arg8[%c0_18, %c0_19] : memref<8x128xf32, #tpu.memory_space<vmem>>, vector<8x128xf32>
    tpu.vector_store %arg8[%c0_18, %c0_19], %27 {strides = array<i32>} : memref<8x128xf32, #tpu.memory_space<vmem>>, vector<8x128xf32>,
    return
  }
  func.func @transform_0(%arg0: i32) -> (i32, i32) {
    %c0_i32 = arith.constant 0 : i32
    %c0_i32_0 = arith.constant 0 : i32
    return %arg0, %c0_i32 : i32, i32
  }
  func.func @transform_1(%arg0: i32) -> (i32, i32) {
    %c0_i32 = arith.constant 0 : i32
    %c0_i32_0 = arith.constant 0 : i32
    %c0_i32_1 = arith.constant 0 : i32
    return %c0_i32, %c0_i32_0 : i32, i32
  }
  func.func @transform_2(%arg0: i32) -> (i32, i32) {
    %c0_i32 = arith.constant 0 : i32
    %c0_i32_0 = arith.constant 0 : i32
    %c0_i32_1 = arith.constant 0 : i32
    return %c0_i32, %c0_i32_0 : i32, i32
  }
  func.func @transform_3(%arg0: i32) -> (i32, i32) {
    %c0_i32 = arith.constant 0 : i32
    %c0_i32_0 = arith.constant 0 : i32
    %c0_i32_1 = arith.constant 0 : i32
    return %c0_i32, %c0_i32_0 : i32, i32
  }
  func.func @transform_4(%arg0: i32) -> (i32, i32) {
    %c0_i32 = arith.constant 0 : i32
    %c0_i32_0 = arith.constant 0 : i32
    %c0_i32_1 = arith.constant 0 : i32
    return %c0_i32, %c0_i32_0 : i32, i32
  }
  func.func @transform_5(%arg0: i32) -> (i32, i32) {
    %c0_i32 = arith.constant 0 : i32
    %c0_i32_0 = arith.constant 0 : i32
    %c0_i32_1 = arith.constant 0 : i32
    return %c0_i32, %c0_i32_0 : i32, i32
  }
  func.func @transform_6(%arg0: i32) -> (i32, i32) {
    %c0_i32 = arith.constant 0 : i32
    %c0_i32_0 = arith.constant 0 : i32
    %c0_i32_1 = arith.constant 0 : i32
    return %c0_i32, %c0_i32_0 : i32, i32
  }
  func.func @transform_7(%arg0: i32) -> (i32, i32) {
    %c0_i32 = arith.constant 0 : i32
    %c0_i32_0 = arith.constant 0 : i32
    return %arg0, %c0_i32 : i32, i32
  }
}

</mosaic_0001>

<bundles_post_ra>
// kernel: actor_forward.1
= control target key start
LH: loop header
LB: loop body
LE: loop exit
PB: predicated region body
PF: predicated region fallthrough
CT: control target
= control target key end

     0   :  { %12 = vsyncpa [#allocation3], 0  ;;  %s443_s0 = inlined_call_operand.vmem [shape: f32[8,16], index: 0, kind: input, shape index: {}]   ;;  %s444_s1 = inlined_call_operand.vmem [shape: f32[16,32], index: 1, kind: input, shape index: {}]   ;;  %s445_s2 = inlined_call_operand.hbm [shape: f32[1,32], index: 2, kind: input, shape index: {}]   ;;  %s446_s3 = inlined_call_operand.hbm [shape: f32[32,32], index: 3, kind: input, shape index: {}]   ;;  %s447_s4 = inlined_call_operand.hbm [shape: f32[1,32], index: 4, kind: input, shape index: {}]   ;;  %s448_s5 = inlined_call_operand.hbm [shape: f32[32,128], index: 5, kind: input, shape index: {}]   ;;  %s449_s6 = inlined_call_operand.hbm [shape: f32[1,128], index: 6, kind: input, shape index: {}]   ;;  %s450_s7 = inlined_call_operand.vmem [shape: f32[8,128], index: 7, kind: output, shape index: {}]  }
   0x1   :  { %13 = vsyncpa [#allocation5], 0  ;;  %s34_s26 = sshll.u32 %s446_s3, 4  ;;  %s35_s26 = int_to_ptr.hbm [resolvable:$true] %s34_s26 }
   0x2   :  { %14 = vsyncpa [#allocation8], 0  ;;  %s369_s27 = smov [#allocation4]   ;;  %s58_s8 = sshll.u32 %s448_s5, 4  ;;  %s59_s8 = int_to_ptr.hbm [resolvable:$true] %s58_s8 }
   0x3   :  { %s36_s28 = sshll.u32 %s369_s27, 4  ;;  %s370_s9 = smov 128   ;;  %s37_s28 = int_to_ptr.vmem [resolvable:$true] %s36_s28 }
   0x4   :  { %s371_s10 = smov 8   ;;  %s372_s11 = smov [#allocation7]  }
   0x5   :  { %42 = dma.hbm_to_vmem [thread:$0]  %s35_s26, 512, %s37_s28, [#allocation5], %s370_s9, %s370_s9, %s371_s10  }
   0x6   :  { %s60_s12 = sshll.u32 %s372_s11, 4  ;;  %s24_s15 = sshll.u32 %s445_s2, 4  ;;  %s61_s12 = int_to_ptr.vmem [resolvable:$true] %s60_s12  ;;  %s25_s15 = int_to_ptr.hbm [resolvable:$true] %s24_s15 }
   0x7   :  { %66 = dma.hbm_to_vmem [thread:$0]  %s59_s8, 512, %s61_s12, [#allocation8], %s370_s9, %s370_s9, %s371_s10  }
   0x8   :  { %s48_s17 = sshll.u32 %s447_s4, 4  ;;  %s373_s18 = smov [#allocation2]   ;;  %s49_s17 = int_to_ptr.hbm [resolvable:$true] %s48_s17 }
   0x9   :  { %s26_s19 = sshll.u32 %s373_s18, 4  ;;  %s374_s5 = smov [#allocation6]   ;;  %s27_s19 = int_to_ptr.vmem [resolvable:$true] %s26_s19 }
   0xa   :  { %29 = dma.hbm_to_vmem [thread:$0]  %s25_s15, 16, %s27_s19, [#allocation3]  }
   0xb   :  { %s50_s20 = sshll.u32 %s374_s5, 4  ;;  %s72_s23 = sshll.u32 %s449_s6, 4  ;;  %s51_s20 = int_to_ptr.vmem [resolvable:$true] %s50_s20  ;;  %s73_s23 = int_to_ptr.hbm [resolvable:$true] %s72_s23 }
   0xc   :  { %53 = dma.hbm_to_vmem [thread:$0]  %s49_s17, 16, %s51_s20, [#allocation5]  }
   0xd   :  { %s375_s2 = smov [#allocation9]  }
   0xe   :  { %s74_s24 = sshll.u32 %s375_s2, 4  ;;  %s75_s24 = int_to_ptr.vmem [resolvable:$true] %s74_s24 }
   0xf   :  { %77 = dma.hbm_to_vmem [thread:$0]  %s73_s23, 16, %s75_s24, [#allocation8]  }
  0x10   :  { %363 = dma.done.wait [#allocation3], 16  }
  0x11   :  { %364 = vsyncadd [#allocation3], 4294967280 }
  0x12   :  { %365 = dma.done.wait [#allocation5], 528  }
  0x13   :  { %366 = vsyncadd [#allocation5], 4294966768 }
  0x14   :  { %367 = dma.done.wait [#allocation8], 528  }
  0x15   :  { %368 = vsyncadd [#allocation8], 4294966768  ;;  %v100_v0 = vld [vmem:[%s444_s1 + $0x8] sm:$0xff]  ;;  %v99_v1 = vld [vmem:[%s444_s1] sm:$0xff]  ;;  %vm105_vm0 = vcmask 130048   ;;  %vm138_vm1 = vcmask 261120  }
  0x16   :  { %123 = vmatpush.msra.mxu0 %v100_v0  ;;  %v98_v2 = vld [vmem:[%s443_s0] sm:$0xff]  ;;  %v132_v4 = vld [vmem:[#allocation4 + $0x10] sm:$0xff]  ;;  %v131_v5 = vld [vmem:[#allocation4 + $0x8] sm:$0xff] }
  0x17   :  { %v133_v3 = vld [vmem:[#allocation4 + $0x18] sm:$0xff]  ;;  %v130_v6 = vld [vmem:[#allocation4] sm:$0xff]  ;;  %v164_v13 = vld [vmem:[#allocation7 + $0x8] sm:$0xff] }
  0x18   :  { %124 = vmatpush.msra.mxu0 %v99_v1  ;;  %154 = vmatpush.msra.mxu1 %v133_v3  ;;  %v166_v7 = vld [vmem:[#allocation7 + $0x18] sm:$0xff]  ;;  %v165_v12 = vld [vmem:[#allocation7 + $0x10] sm:$0xff]  ;;  %v163_v14 = vld [vmem:[#allocation7] sm:$0xff] }
  0x19   :  { %224 = vmatmul.msk.f32.vlgmr.msra.gmra.mxu0 %vm105_vm0, %v98_v2  ;;  %186 = vmatpush.msra.mxu2 %v166_v7  ;;  %v234_v8 = vld [vmem:[#allocation2] ss:$0 sm:$0xff]  ;;  %v235_v15 = vld [vmem:[#allocation6] ss:$0 sm:$0xff]  ;;  %v236_v19 = vld [vmem:[#allocation9] ss:$0 sm:$0xff] }
  0x1a   :  { %155 = vmatpush.msra.mxu1 %v132_v4 }
  0x1b   :  { %187 = vmatpush.msra.mxu2 %v165_v12 }
  0x1c   :  { %156 = vmatpush.msra.mxu1 %v131_v5 }
  0x1d   :  { %188 = vmatpush.msra.mxu2 %v164_v13 }
  0x1e   :  { %157 = vmatpush.msra.mxu1 %v130_v6 }
  0x1f   :  { %189 = vmatpush.msra.mxu2 %v163_v14 }
  0x96   :  { %v126_v9 = vpop.f32.mrf.mxu0 }
  0x97   :  { %v127_v10 = vadd.f32 %v234_v8, %v126_v9 }
  0x99   :  { %237 = vtanh.f32 %v127_v10 }
  0x9f   :  { %v238_v11 = vpop.eup %237 }
  0xa0   :  { %225 = vmatmul.msk.f32.vlgmr.msra.gmra.mxu1 %vm138_vm1, %v238_v11 }
 0x11d   :  { %v159_v16 = vpop.f32.mrf.mxu1 }
 0x11e   :  { %v160_v17 = vadd.f32 %v235_v15, %v159_v16 }
 0x120   :  { %v162_v18 = vmax.f32 %v160_v17, 0.0 }
 0x122   :  { %226 = vmatmul.msk.f32.vlgmr.msra.gmra.mxu2 %vm138_vm1, %v162_v18 }
 0x1a5   :  { %v191_v20 = vpop.f32.mrf.mxu2 }
 0x1a6   :  { %v192_v21 = vadd.f32 %v236_v19, %v191_v20 }
 0x1a8   :  { %194 = vmax.xlane.f32.xlu0 %v192_v21 }
 0x21b   :  { %v195_v22 = vpop.xlane.xlu0 %194 }
 0x21c   :  { %v196_v23 = vsub.f32 %v192_v21, %v195_v22 }
 0x21e   :  { %v197_v24 = vmul.f32 1.442695, %v196_v23 }
 0x220   :  { %239 = vpow2.f32 %v197_v24 }
 0x226   :  { %v240_v25 = vpop.eup %239 }
 0x227   :  { %199 = vadd.xlane.f32.xlu0 %v240_v25 }
 0x29a   :  { %v200_v26 = vpop.xlane.xlu0 %199 }
 0x29b   :  { %241 = vrcp.f32 %v200_v26  ;;  %v212_v30 = vand.u32 2147483648, %v200_v26  ;;  %v210_v32 = vand.u32 2147483647, %v200_v26  ;;  %vm206_vm3 = vweird.f32 %v200_v26 }
 0x29d   :  { %v213_v34 = vor.u32 1.1754944e-38, %v212_v30  ;;  %vm211_vm5 = vcmp.eq.f32.partialorder %v210_v32, 8.507059e+37 }
 0x2a1   :  { %v242_v27 = vpop.eup %241 }
 0x2a2   :  { %v202_v28 = vmul.f32 %v242_v27, %v200_v26  ;;  %vm207_vm2 = vweird.f32 %v242_v27 }
 0x2a3   :  { %vm208_vm4 = vmor %vm206_vm3, %vm207_vm2 }
 0x2a4   :  { %v203_v29 = vsub.f32 1.0, %v202_v28 }
 0x2a6   :  { %v204_v31 = vmul.f32 %v242_v27, %v203_v29 }
 0x2a8   :  { %v205_v33 = vadd.f32 %v242_v27, %v204_v31 }
 0x2aa   :  { %v209_v35 = vsel %vm208_vm4, %v242_v27, %v205_v33 }
 0x2ab   :  { %v214_v36 = vsel %vm211_vm5, %v213_v34, %v209_v35 }
 0x2ac   :  { %v215_v37 = vmul.f32 %v240_v25, %v214_v36 }
 0x2ae   :  { %216 = vst [vmem:[%s450_s7] sm:$0xff] %v215_v37 }
 0x2af   :  { %221 = vsyncpa [#allocation3], 1 }
 0x2b0   :  { %222 = vsyncpa [#allocation5], 1 }
 0x2b1   :  { %223 = vsyncpa [#allocation8], 1 }

</bundles_post_ra>
